<compile_context>
chip_gen: v7x
topology: tpu7x:2x2x1
jax: 0.10.0
libtpu: 0.0.40
codegen_flags: <defaults>
</compile_context>

<pallas_src>
import jax
import jax.numpy as jnp
from jax.experimental import pallas as pl
from jax.experimental.pallas import tpu as pltpu

NEG_SLOPE = 0.01   # torch.nn.LeakyReLU default
BN_EPS = 1e-5      # torch.nn.BatchNorm1d default
L2_EPS = 1e-12     # torch.nn.functional.normalize default


def _round_up(n, m):
    return (n + m - 1) // m * m


def base_message_layer_kernel(a_ref, xsp_ref, xd_ref, dinv_ref, wr_ref, b_ref,
                              out_ref, acc_ref):
    k = pl.program_id(1)

    @pl.when(k == 0)
    def _():
        acc_ref[...] = jnp.zeros_like(acc_ref)

    # Accumulate A_tile @ (X W_l) with the projected source features resident in
    # VMEM (sliced, not re-streamed).  int8 0/1 adjacency -> bf16 is exact.
    tk = a_ref.shape[1]
    start = pl.multiple_of(k * tk, tk)
    xs = xsp_ref[pl.ds(start, tk), :]
    a = a_ref[...].astype(jnp.float32).astype(jnp.bfloat16)
    acc_ref[...] += jnp.dot(a, xs, preferred_element_type=jnp.float32)

    @pl.when(k == pl.num_programs(1) - 1)
    def _():
        x = xd_ref[...]                               # f32 destination features
        # mean aggregation: exact f32 1/deg scale applied once here
        out = (acc_ref[...] * dinv_ref[...]
               + jnp.dot(x, wr_ref[...], preferred_element_type=jnp.float32)
               + b_ref[...])                          # BN + SAGE bias folded in
        out = jnp.where(out >= 0.0, out, NEG_SLOPE * out)   # LeakyReLU
        out = out + x                                        # skipsum
        sumsq = jnp.sum(out * out, axis=-1, keepdims=True)   # L2 normalize (EUP rsqrt)
        out = out * jax.lax.rsqrt(jnp.maximum(sumsq, L2_EPS * L2_EPS))
        out_ref[...] = out.astype(out_ref.dtype)


def base_message_layer(x, edge_index, params, *, tm=512, tk=2048):
    n, f = x.shape
    h = params["wl"].shape[1]

    # --- host-side prep: fold inference BN + SAGE bias into the weights -----
    scale = params["gamma"] * jax.lax.rsqrt(params["var"] + BN_EPS)          # [1,H]
    wl_f = (params["wl"] * scale).astype(jnp.float32)                        # [F,H]
    wr_f = (params["wr"] * scale).astype(jnp.float32)                        # [F,H]
    b_f = ((params["bl"] - params["mean"]) * scale
           + params["beta"]).astype(jnp.float32)                             # [1,H]

    # --- tiling (int8 A: row tile mult of 32, contraction mult of 128) ------
    tm = _round_up(min(tm, _round_up(n, 32)), 32)
    tk = _round_up(min(tk, _round_up(n, 128)), 128)
    n_r = _round_up(n, tm)
    if n_r // tm < 2 and tm >= 64:
        # ensure >= 2 row tiles so the "parallel" axis can use both TCs (v7x)
        tm = _round_up(tm // 2, 32)
        n_r = _round_up(n, tm)
    n_c = _round_up(n, tk)
    grid = (n_r // tm, n_c // tk)

    # --- graph data: built directly at padded shape / target dtype ----------
    src = edge_index[0]
    dst = edge_index[1]
    a = jnp.zeros((n_r, n_c), jnp.int8).at[dst, src].add(jnp.ones((), jnp.int8))
    deg = jnp.zeros((n_r, 1), jnp.float32).at[dst, 0].add(1.0)
    deg_inv = 1.0 / jnp.maximum(deg, 1.0)            # padded / isolated rows -> 1

    # Fold W_l into the streamed source features (exact by linearity of the sum).
    x_src_proj = jnp.pad((x @ wl_f).astype(jnp.bfloat16), ((0, n_c - n), (0, 0)))
    x_dst = jnp.pad(x.astype(jnp.float32), ((0, n_r - n), (0, 0)))

    out = pl.pallas_call(
        base_message_layer_kernel,
        out_shape=jax.ShapeDtypeStruct((n_r, h), jnp.float32),
        grid=grid,
        in_specs=[
            pl.BlockSpec((tm, tk), lambda i, k: (i, k)),   # A tile (int8 0/1)
            pl.BlockSpec((n_c, h), lambda i, k: (0, 0)),   # X @ W_l, VMEM-resident
            pl.BlockSpec((tm, f), lambda i, k: (i, 0)),    # X dest rows (f32)
            pl.BlockSpec((tm, 1), lambda i, k: (i, 0)),    # 1/deg (f32)
            pl.BlockSpec((f, h), lambda i, k: (0, 0)),     # W_r (BN folded)
            pl.BlockSpec((1, h), lambda i, k: (0, 0)),     # fused bias
        ],
        out_specs=pl.BlockSpec((tm, h), lambda i, k: (i, 0)),
        scratch_shapes=[pltpu.VMEM((tm, h), jnp.float32)],
        compiler_params=pltpu.CompilerParams(
            dimension_semantics=("parallel", "arbitrary"),
            vmem_limit_bytes=48 * 1024 * 1024,
        ),
    )(a, x_src_proj, x_dst, deg_inv, wr_f, b_f)

    return out[:n]


def reference(x, edge_index, params):
    """Exact f32 reference of the PyTorch forward pass (inference BatchNorm)."""
    n = x.shape[0]
    src, dst = edge_index[0], edge_index[1]
    a = jnp.zeros((n, n), jnp.float32).at[dst, src].add(1.0)
    deg = jnp.maximum(jnp.sum(a, axis=1, keepdims=True), 1.0)
    agg = (a @ x) / deg
    out = agg @ params["wl"] + params["bl"] + x @ params["wr"]
    out = (out - params["mean"]) / jnp.sqrt(params["var"] + BN_EPS) \
          * params["gamma"] + params["beta"]
    out = jnp.where(out >= 0.0, out, NEG_SLOPE * out)
    out = out + x
    norm = jnp.linalg.norm(out, axis=-1, keepdims=True)
    return out / jnp.maximum(norm, L2_EPS)


if __name__ == "__main__":
    # Small, but tiled so the (row x contraction) accumulator grid is exercised.
    N, F, H, E = 512, 32, 32, 2048   # in_channels == hidden_channels (skipsum)

    key = jax.random.PRNGKey(0)
    kx, ke1, ke2, kwl, kbl, kwr, kg, kb, km, kv = jax.random.split(key, 10)

    x = jax.random.normal(kx, (N, F), dtype=jnp.float32)
    src = jax.random.randint(ke1, (E,), 0, N)
    dst = jax.random.randint(ke2, (E,), 0, N)
    edge_index = jnp.stack([src, dst], axis=0)          # [2, E]

    w_scale = 1.0 / jnp.sqrt(jnp.float32(F))
    params = {
        # SAGEConv linear weights stored as [F_in, H] (x @ W layout)
        "wl": jax.random.uniform(kwl, (F, H), jnp.float32, -w_scale, w_scale),
        "bl": jax.random.uniform(kbl, (1, H), jnp.float32, -w_scale, w_scale),
        "wr": jax.random.uniform(kwr, (F, H), jnp.float32, -w_scale, w_scale),
        # BatchNorm1d affine + running stats (inference mode)
        "gamma": 1.0 + 0.1 * jax.random.normal(kg, (1, H), jnp.float32),
        "beta": 0.1 * jax.random.normal(kb, (1, H), jnp.float32),
        "mean": 0.1 * jax.random.normal(km, (1, H), jnp.float32),
        "var": 1.0 + 0.1 * jax.random.uniform(kv, (1, H), jnp.float32),
    }

    # Small tiles here so the 2-D grid (4 row tiles x 4 k tiles) is exercised.
    out = base_message_layer(x, edge_index, params, tm=128, tk=128)
    out = jax.block_until_ready(out)

    ref = reference(x, edge_index, params)
    assert out.shape == (N, H)
    max_err = float(jnp.max(jnp.abs(out - ref)))
    # Only remaining quantization: (x @ W_l) streamed in bf16 + bf16 MXU matmul.
    assert jnp.allclose(out, ref, atol=1e-2, rtol=1e-2), \
        f"mismatch vs reference (max abs err {max_err})"

    print("KERNEL_OK")
</pallas_src>

<mosaic_0001>
module attributes {stable_mosaic.version = 11 : i64} {
  func.func @base_message_layer_kernel(%arg0: i32, %arg1: i32, %arg2: memref<128x128xi8, #tpu.memory_space<vmem>>, %arg3: memref<512x32xbf16, #tpu.memory_space<vmem>>, %arg4: memref<128x32xf32, #tpu.memory_space<vmem>>, %arg5: memref<128x1xf32, #tpu.memory_space<vmem>>, %arg6: memref<32x32xf32, #tpu.memory_space<vmem>>, %arg7: memref<1x32xf32, #tpu.memory_space<vmem>>, %arg8: memref<128x32xf32, #tpu.memory_space<vmem>>, %arg9: memref<128x32xf32, #tpu.memory_space<vmem>>) attributes {dimension_semantics = [#tpu.dimension_semantics<parallel>, #tpu.dimension_semantics<arbitrary>], iteration_bounds = array<i64: 4, 4>, scalar_prefetch = 0 : i64, scratch_operands = 1 : i64, tpu.core_type = #tpu.core_type<tc>, window_params = [{transform_indices = @transform_0, window_bounds = array<i64: 128, 128>}, {pipeline_mode = #tpu.pipeline_mode<synchronous>, transform_indices = @transform_1, window_bounds = array<i64: 512, 32>}, {transform_indices = @transform_2, window_bounds = array<i64: 128, 32>}, {transform_indices = @transform_3, window_bounds = array<i64: 128, 1>}, {pipeline_mode = #tpu.pipeline_mode<synchronous>, transform_indices = @transform_4, window_bounds = array<i64: 32, 32>}, {pipeline_mode = #tpu.pipeline_mode<synchronous>, transform_indices = @transform_5, window_bounds = array<i64: 1, 32>}, {transform_indices = @transform_6, window_bounds = array<i64: 128, 32>}]} {
    %c0_i32 = arith.constant 0 : i32
    %0 = arith.cmpi eq, %arg1, %c0_i32 : i32
    %1 = arith.extui %0 : i1 to i32
    %c0_i32_0 = arith.constant 0 : i32
    %2 = arith.cmpi ne, %1, %c0_i32_0 : i32
    scf.if %2 {
      %cst_8 = arith.constant 0.000000e+00 : f32
      %17 = vector.broadcast %cst_8 : f32 to vector<128x32xf32>
      %c0_9 = arith.constant 0 : index
      %c0_10 = arith.constant 0 : index
      %18 = vector.load %arg9[%c0_9, %c0_10] : memref<128x32xf32, #tpu.memory_space<vmem>>, vector<128x32xf32>
      tpu.vector_store %arg9[%c0_9, %c0_10], %17 {strides = array<i32>} : memref<128x32xf32, #tpu.memory_space<vmem>>, vector<128x32xf32>,
    } else {
    }
    %c128_i32 = arith.constant 128 : i32
    %3 = arith.muli %arg1, %c128_i32 : i32
    %4 = tpu.assume_multiple %3, 128 : i32
    %5 = arith.index_cast %4 : i32 to index
    %c0 = arith.constant 0 : index
    %6 = vector.load %arg3[%5, %c0] : memref<512x32xbf16, #tpu.memory_space<vmem>>, vector<128x32xbf16>
    %c0_1 = arith.constant 0 : index
    %c0_2 = arith.constant 0 : index
    %7 = vector.load %arg2[%c0_1, %c0_2] : memref<128x128xi8, #tpu.memory_space<vmem>>, vector<128x128xi8>
    %8 = arith.sitofp %7 : vector<128x128xi8> to vector<128x128xf32>
    %9 = arith.truncf %8 : vector<128x128xf32> to vector<128x128xbf16>
    %c0_3 = arith.constant 0 : index
    %c0_4 = arith.constant 0 : index
    %10 = vector.load %arg9[%c0_3, %c0_4] : memref<128x32xf32, #tpu.memory_space<vmem>>, vector<128x32xf32>
    %cst = arith.constant dense<0.000000e+00> : vector<128x32xf32>
    %11 = tpu.matmul %9, %6, %cst {dimension_numbers = #tpu.dot_dimension_numbers<[1], [0], [0], [1], [0, 0, 1, 1], [], []>} : vector<128x128xbf16>, vector<128x32xbf16>, vector<128x32xf32> -> vector<128x32xf32>
    %12 = arith.addf %10, %11 : vector<128x32xf32>
    %c0_5 = arith.constant 0 : index
    %c0_6 = arith.constant 0 : index
    %13 = vector.load %arg9[%c0_5, %c0_6] : memref<128x32xf32, #tpu.memory_space<vmem>>, vector<128x32xf32>
    tpu.vector_store %arg9[%c0_5, %c0_6], %12 {strides = array<i32>} : memref<128x32xf32, #tpu.memory_space<vmem>>, vector<128x32xf32>,
    %c3_i32 = arith.constant 3 : i32
    %14 = arith.cmpi eq, %arg1, %c3_i32 : i32
    %15 = arith.extui %14 : i1 to i32
    %c0_i32_7 = arith.constant 0 : i32
    %16 = arith.cmpi ne, %15, %c0_i32_7 : i32
    scf.if %16 {
      %c0_8 = arith.constant 0 : index
      %c0_9 = arith.constant 0 : index
      %17 = vector.load %arg4[%c0_8, %c0_9] : memref<128x32xf32, #tpu.memory_space<vmem>>, vector<128x32xf32>
      %c0_10 = arith.constant 0 : index
      %c0_11 = arith.constant 0 : index
      %18 = vector.load %arg9[%c0_10, %c0_11] : memref<128x32xf32, #tpu.memory_space<vmem>>, vector<128x32xf32>
      %c0_12 = arith.constant 0 : index
      %c0_13 = arith.constant 0 : index
      %19 = vector.load %arg5[%c0_12, %c0_13] : memref<128x1xf32, #tpu.memory_space<vmem>>, vector<128x1xf32>
      %20 = vector.broadcast %19 : vector<128x1xf32> to vector<128x32xf32>
      %21 = arith.mulf %18, %20 : vector<128x32xf32>
      %c0_14 = arith.constant 0 : index
      %c0_15 = arith.constant 0 : index
      %22 = vector.load %arg6[%c0_14, %c0_15] : memref<32x32xf32, #tpu.memory_space<vmem>>, vector<32x32xf32>
      %cst_16 = arith.constant dense<0.000000e+00> : vector<128x32xf32>
      %23 = tpu.matmul %17, %22, %cst_16 {dimension_numbers = #tpu.dot_dimension_numbers<[1], [0], [0], [1], [0, 0, 1, 1], [], []>} : vector<128x32xf32>, vector<32x32xf32>, vector<128x32xf32> -> vector<128x32xf32>
      %24 = arith.addf %21, %23 : vector<128x32xf32>
      %c0_17 = arith.constant 0 : index
      %c0_18 = arith.constant 0 : index
      %25 = vector.load %arg7[%c0_17, %c0_18] : memref<1x32xf32, #tpu.memory_space<vmem>>, vector<1x32xf32>
      %26 = vector.broadcast %25 : vector<1x32xf32> to vector<128x32xf32>
      %27 = arith.addf %24, %26 : vector<128x32xf32>
      %cst_19 = arith.constant 0.000000e+00 : f32
      %28 = vector.broadcast %cst_19 : f32 to vector<128x32xf32>
      %29 = arith.cmpf oge, %27, %28 : vector<128x32xf32>
      %cst_20 = arith.constant 0.00999999977 : f32
      %30 = vector.broadcast %cst_20 : f32 to vector<128x32xf32>
      %31 = arith.mulf %30, %27 : vector<128x32xf32>
      %32 = arith.select %29, %27, %31 : vector<128x32xi1>, vector<128x32xf32>
      %33 = arith.addf %32, %17 : vector<128x32xf32>
      %34 = arith.mulf %33, %33 : vector<128x32xf32>
      %cst_21 = arith.constant dense<0.000000e+00> : vector<128xf32>
      %35 = vector.multi_reduction <add>, %34, %cst_21 [1] : vector<128x32xf32> to vector<128xf32>
      %36 = vector.shape_cast %35 : vector<128xf32> to vector<128x1xf32>
      %cst_22 = arith.constant 1.000000e-24 : f32
      %37 = vector.broadcast %cst_22 : f32 to vector<128x1xf32>
      %38 = arith.maximumf %36, %37 : vector<128x1xf32>
      %39 = math.rsqrt %38 : vector<128x1xf32>
      %40 = vector.broadcast %39 : vector<128x1xf32> to vector<128x32xf32>
      %41 = arith.mulf %33, %40 : vector<128x32xf32>
      %c0_23 = arith.constant 0 : index
      %c0_24 = arith.constant 0 : index
      %42 = vector.load %arg8[%c0_23, %c0_24] : memref<128x32xf32, #tpu.memory_space<vmem>>, vector<128x32xf32>
      tpu.vector_store %arg8[%c0_23, %c0_24], %41 {strides = array<i32>} : memref<128x32xf32, #tpu.memory_space<vmem>>, vector<128x32xf32>,
    } else {
    }
    return
  }
  func.func @transform_0(%arg0: i32, %arg1: i32) -> (i32, i32) {
    %c0_i32 = arith.constant 0 : i32
    return %arg0, %arg1 : i32, i32
  }
  func.func @transform_1(%arg0: i32, %arg1: i32) -> (i32, i32) {
    %c0_i32 = arith.constant 0 : i32
    %c0_i32_0 = arith.constant 0 : i32
    %c0_i32_1 = arith.constant 0 : i32
    return %c0_i32, %c0_i32_0 : i32, i32
  }
  func.func @transform_2(%arg0: i32, %arg1: i32) -> (i32, i32) {
    %c0_i32 = arith.constant 0 : i32
    %c0_i32_0 = arith.constant 0 : i32
    return %arg0, %c0_i32 : i32, i32
  }
  func.func @transform_3(%arg0: i32, %arg1: i32) -> (i32, i32) {
    %c0_i32 = arith.constant 0 : i32
    %c0_i32_0 = arith.constant 0 : i32
    return %arg0, %c0_i32 : i32, i32
  }
  func.func @transform_4(%arg0: i32, %arg1: i32) -> (i32, i32) {
    %c0_i32 = arith.constant 0 : i32
    %c0_i32_0 = arith.constant 0 : i32
    %c0_i32_1 = arith.constant 0 : i32
    return %c0_i32, %c0_i32_0 : i32, i32
  }
  func.func @transform_5(%arg0: i32, %arg1: i32) -> (i32, i32) {
    %c0_i32 = arith.constant 0 : i32
    %c0_i32_0 = arith.constant 0 : i32
    %c0_i32_1 = arith.constant 0 : i32
    return %c0_i32, %c0_i32_0 : i32, i32
  }
  func.func @transform_6(%arg0: i32, %arg1: i32) -> (i32, i32) {
    %c0_i32 = arith.constant 0 : i32
    %c0_i32_0 = arith.constant 0 : i32
    return %arg0, %c0_i32 : i32, i32
  }
}

</mosaic_0001>

<bundles_post_ra>
// kernel: tpu_custom_call.1
= control target key start
LH: loop header
LB: loop body
LE: loop exit
PB: predicated region body
PF: predicated region fallthrough
CT: control target
= control target key end

     0   :  { %s1657_s21 = smov 0   ;;  %s1659_s22 = smov 0   ;;  %s2114_s0 = inlined_call_operand.vmem [shape: s8[512,512], index: 0, kind: input, shape index: {}]   ;;  %s2115_s1 = inlined_call_operand.vmem [shape: bf16[512,32], index: 1, kind: input, shape index: {}]   ;;  %s2116_s2 = inlined_call_operand.vmem [shape: f32[512,32], index: 2, kind: input, shape index: {}]   ;;  %s2117_s3 = inlined_call_operand.vmem [shape: f32[512,1], index: 3, kind: input, shape index: {}]   ;;  %s2118_s4 = inlined_call_operand.vmem [shape: f32[32,32], index: 4, kind: input, shape index: {}]   ;;  %s2119_s5 = inlined_call_operand.vmem [shape: f32[1,32], index: 5, kind: input, shape index: {}]   ;;  %s2120_s6 = inlined_call_operand.vmem [shape: f32[512,32], index: 6, kind: output, shape index: {}]  }
   0x1   :  { %s1661_s23 = smov 0   ;;  %s1663_s24 = smov 0  }
   0x2   :  { %s1665_s25 = smov 0   ;;  %s1667_s26 = smov 0  }
   0x3   :  { %s1669_s27 = smov 0  }
   0x4 LB: > { %s25_s28 = sadd.s32 1, %s1610_s25  ;;  %s28_s29 = sadd.s32 1, %s1614_s26  ;;  %s1618_s27 = sphi %s1669_s27, %s16_s27   ;;  %s1614_s26 = sphi %s1667_s26, %s2126_s26   ;;  %s1610_s25 = sphi %s1665_s25, %s2125_s25   ;;  %s1606_s24 = sphi %s1663_s24, %s2124_s24   ;;  %s1602_s23 = sphi %s1661_s23, %s2123_s23   ;;  %s1598_s22 = sphi %s1659_s22, %s2122_s22   ;;  %s1594_s21 = sphi %s1657_s21, %s2121_s21  }
   0x5   : > { %p26_p0 = scmp.ge.s32.totalorder %s25_s28, 4  ;;  %p44_p1 = scmp.ne.s32.totalorder %s1598_s22, %s1594_s21 }
   0x6   : > { %p45_p2 = scmp.eq.s32.totalorder %s1618_s27, 0  ;;  %s37_s9 = sadd.s32 1, %s1598_s22 }
   0x7   : > { %s2128_s28 = smov (%p26_p0, %s25_s28), 0  ;;  %s2130_s29 = smov (!%p26_p0, %s28_s29), %s1614_s26 }
   0x8   : > { %p46_p3 = por %p45_p2, %p44_p1  ;;  %p30_p4 = scmp.ge.s32.totalorder %s2130_s29, 4 }
   0x9   : > { %s33_s30 = ssub.s32 %s1610_s25, %s2128_s28  ;;  %p1291_p6 = scmp.ge.s32.totalorder %s1618_s27, 16 }
   0xa   : > { %s2132_s29 = smov (%p30_p4, %s2130_s29), 0 }
   0xb   : > { %s32_s7 = ssub.s32 %s1614_s26, %s2132_s29  ;;  %220 = sbr.rel (%p1291_p6) target bundleno = 28 (0x1c), region = 28 }
   0xc   : > { %s34_s8 = sor.u32 %s33_s30, %s32_s7 }
   0xd   : > { %p35_p5 = scmp.eq.s32.totalorder %s34_s8, 0 }
   0xf   : > { %s1708_s10 = scalar_select %p35_p5, %s1598_s22, %s37_s9  }
  0x12   : > { %223 = sbr.rel (!%p46_p3) target bundleno = 28 (0x1c), region = 32  ;;  %s225_s11 = sand.u32 (%p46_p3), 1, %s1598_s22  }
  0x13   : > { %s1335_s12 = sshll.u32 (%p46_p3), %s1614_s26, 4  ;;  %s1292_s13 = sshll.u32 (%p46_p3), %s225_s11, 5 }
  0x14   : > { %s230_s14 = sadd.s32 (%p46_p3), %s1610_s25, %s1335_s12  ;;  %s227_s19 = scalar_lea.vmem (%p46_p3), [#allocation3], %s1292_s13 }
  0x15   : > { %s1295_s15 = sshll.u32 (%p46_p3), %s230_s14, 3 }
  0x16   : > { %s232_s18 = scalar_lea.vmem (%p46_p3), %s2114_s0, %s1295_s15 }
  0x17   : > { %v266_v0 = vld [vmem:[%s232_s18] sm:$0xff] (%p46_p3) }
  0x18   : > { %v268_v1 = vld [vmem:[%s232_s18 + $0x20] sm:$0xff] (%p46_p3)  ;;  %267 = vst [vmem:[%s227_s19] sm:$0xff] (%p46_p3), %v266_v0 }
  0x19   : > { %v270_v2 = vld [vmem:[%s232_s18 + $0x40] sm:$0xff]  ;;  %269 = vst [vmem:[%s227_s19 + $0x8] sm:$0xff] %v268_v1 }
  0x1a   : > { %271 = vst [vmem:[%s227_s19 + $0x10] sm:$0xff] %v270_v2  ;;  %v272_v3 = vld [vmem:[%s232_s18 + $0x60] sm:$0xff] }
  0x1b   : > { %273 = vst [vmem:[%s227_s19 + $0x18] sm:$0xff] %v272_v3 }
  0x1c PF: > { %p1296_p7 = scmp.ge.s32.totalorder %s1618_s27, 1  ;;  %p296_p8 = scmp.lt.s32.totalorder %s1618_s27, 17 }
  0x1e   : > { %p297_p9 = pnand %p1296_p7, %p296_p8 }
  0x1f   : > { %s303_s20 = sand.u32 (!%p297_p9), 1, %s1594_s21   ;;  %s1298_s30 = sshll.u32 (!%p297_p9), %s1606_s24, 4 }
  0x20   : > { %300 = sbr.rel (%p297_p9) target bundleno = 717 (0x2cd), region = 78  ;;  %s1297_s7 = sshll.u32 (!%p297_p9), %s303_s20, 5 }
  0x21   : > { %p344_p10 = scmp.lt.s32.totalorder (!%p297_p9), %s1298_s30, 63  ;;  %s1736_s21 = scalar_lea.vmem (!%p297_p9), [#allocation3], %s1297_s7 }
  0x22   : > { %p1304_p11 = scmp.ne.s32.totalorder (!%p297_p9), %s1602_s23, 0 }
  0x27   : > { %s2134_s30 = smov (!%p344_p10, %s1298_s30), 63  ;;  %365 = sbr.rel (%p1304_p11) target bundleno = 49 (0x31), region = 86 }
  0x28   : > { %s1299_s8 = sshll.u32 %s2134_s30, 3  ;;  %vm366_vm0 = vcmask (!%p1304_p11), 261120   ;;  %v1620_v4 = vmov (!%p1304_p11), 0.0  }
  0x29   : > { %s1724_s12 = scalar_lea.vmem %s2116_s2, %s1299_s8  ;;  %s1729_s15 = scalar_lea.vmem %s2117_s3, %s1299_s8  ;;  %367 = vst.msk [vmem:[#allocation2] sm:$0xff] (!%p1304_p11), %vm366_vm0, %v1620_v4  ;;  %368 = vst.msk [vmem:[#allocation2 + $0x8] sm:$0xff] (!%p1304_p11), %vm366_vm0, %v1620_v4 }
  0x2a   : > { %s1734_s18 = scalar_lea.vmem %s2120_s6, %s1299_s8  ;;  %369 = vst.msk [vmem:[#allocation2 + $0x10] sm:$0xff] (!%p1304_p11), %vm366_vm0, %v1620_v4  ;;  %370 = vst.msk [vmem:[#allocation2 + $0x18] sm:$0xff] (!%p1304_p11), %vm366_vm0, %v1620_v4 }
  0x2b   : > { %371 = vst.msk [vmem:[#allocation2 + $0x20] sm:$0xff] (!%p1304_p11), %vm366_vm0, %v1620_v4  ;;  %372 = vst.msk [vmem:[#allocation2 + $0x28] sm:$0xff] (!%p1304_p11), %vm366_vm0, %v1620_v4 }
  0x2c   : > { %373 = vst.msk [vmem:[#allocation2 + $0x30] sm:$0xff] (!%p1304_p11), %vm366_vm0, %v1620_v4  ;;  %374 = vst.msk [vmem:[#allocation2 + $0x38] sm:$0xff] (!%p1304_p11), %vm366_vm0, %v1620_v4 }
  0x2d   : > { %375 = vst.msk [vmem:[#allocation2 + $0x40] sm:$0xff] (!%p1304_p11), %vm366_vm0, %v1620_v4  ;;  %376 = vst.msk [vmem:[#allocation2 + $0x48] sm:$0xff] (!%p1304_p11), %vm366_vm0, %v1620_v4 }
  0x2e   : > { %377 = vst.msk [vmem:[#allocation2 + $0x50] sm:$0xff] %vm366_vm0, %v1620_v4  ;;  %378 = vst.msk [vmem:[#allocation2 + $0x58] sm:$0xff] %vm366_vm0, %v1620_v4 }
  0x2f   : > { %379 = vst.msk [vmem:[#allocation2 + $0x60] sm:$0xff] %vm366_vm0, %v1620_v4  ;;  %380 = vst.msk [vmem:[#allocation2 + $0x68] sm:$0xff] %vm366_vm0, %v1620_v4 }
  0x30   : > { %381 = vst.msk [vmem:[#allocation2 + $0x70] sm:$0xff] %vm366_vm0, %v1620_v4  ;;  %382 = vst.msk [vmem:[#allocation2 + $0x78] sm:$0xff] %vm366_vm0, %v1620_v4 }
  0x31 PF: > { %s1305_s24 = sshll.u32 %s1602_s23, 7  ;;  %v404_v5 = vld [vmem:[%s1736_s21] sm:$0xff]  ;;  %v406_v6 = vld [vmem:[%s1736_s21 + $0x10] sm:$0xff]  ;;  %v405_v17 = vld [vmem:[%s1736_s21 + $0x8] sm:$0xff]  ;;  %vm593_vm1 = vcmask 261120   ;;  %p1315_p12 = scmp.ne.s32.totalorder %s1602_s23, 3 }
  0x32   : > { %s384_s19 = sshra.s32 %s1305_s24, 3  ;;  %v408_v7 = vunpack.c.l.s8.bf16 %v404_v5  ;;  %v412_v8 = vunpack.c.l.s8.bf16 %v406_v6  ;;  %v407_v18 = vld [vmem:[%s1736_s21 + $0x18] sm:$0xff]  ;;  %v409_v19 = vunpack.c.h.s8.bf16 %v404_v5  ;;  %v413_v20 = vunpack.c.h.s8.bf16 %v406_v6 }
  0x33   : > { %s1306_s20 = sshll.u32 %s384_s19, 2  ;;  %v410_v21 = vunpack.c.l.s8.bf16 %v405_v17  ;;  %v414_v22 = vunpack.c.l.s8.bf16 %v407_v18  ;;  %v411_v23 = vunpack.c.h.s8.bf16 %v405_v17  ;;  %v415_v24 = vunpack.c.h.s8.bf16 %v407_v18  ;;  %v416_v27 = vld [vmem:[#allocation2] sm:$0xff]  ;;  %v417_v37 = vld [vmem:[#allocation2 + $0x8] sm:$0xff]  ;;  %v648_v18 = vld [vmem:[%s1729_s15 + $0x10] sm:$0xff] (!%p1315_p12) }
  0x34   : > { %s1761_s8 = scalar_lea.vmem %s2115_s1, %s1306_s20  ;;  %1388 = vmatprep.mubr.bf16.mxu0 %v408_v7  ;;  %1396 = vmatprep.mubr.bf16.mxu1 %v412_v8  ;;  %v418_v25 = vld [vmem:[#allocation2 + $0x10] sm:$0xff]  ;;  %v419_v31 = vld [vmem:[#allocation2 + $0x18] sm:$0xff] }
  0x35   : > { %v1522_v9 = vld [vmem:[%s1761_s8] sm:$0xff]   ;;  %v1523_v10 = vld [vmem:[%s1761_s8 + $0x8] sm:$0xff]   ;;  %v1524_v11 = vld [vmem:[%s1761_s8 + $0x10] sm:$0xff]  }
  0x36   : > { %1372 = vmatprep.subr.bf16.mxu0 %v1522_v9  ;;  %1444 = vmatprep.subr.bf16.mxu1 %v1522_v9  ;;  %v1525_v12 = vld [vmem:[%s1761_s8 + $0x18] sm:$0xff]   ;;  %v1526_v13 = vld [vmem:[%s1761_s8 + $0x20] sm:$0xff]   ;;  %v1527_v14 = vld [vmem:[%s1761_s8 + $0x28] sm:$0xff]  }
  0x37   : > { %1373 = vmatpush3.bf16.msra.mxu0 %v1522_v9  ;;  %1452 = vmatpush3.bf16.msra.mxu1 %v1522_v9  ;;  %v1528_v15 = vld [vmem:[%s1761_s8 + $0x30] sm:$0xff]   ;;  %v1529_v16 = vld [vmem:[%s1761_s8 + $0x38] sm:$0xff]   ;;  %v424_v28 = vld [vmem:[#allocation2 + $0x40] sm:$0xff] }
  0x38   : > { %1374 = vmatprep.subr.bf16.mxu0 %v1523_v10  ;;  %1445 = vmatprep.subr.bf16.mxu1 %v1523_v10  ;;  %v426_v26 = vld [vmem:[#allocation2 + $0x50] sm:$0xff]  ;;  %v427_v32 = vld [vmem:[#allocation2 + $0x58] sm:$0xff]  ;;  %v425_v38 = vld [vmem:[#allocation2 + $0x48] sm:$0xff] }
  0x39   : > { %v422_v49 = vld [vmem:[#allocation2 + $0x30] sm:$0xff]  ;;  %v420_v51 = vld [vmem:[#allocation2 + $0x20] sm:$0xff]  ;;  %v423_v55 = vld [vmem:[#allocation2 + $0x38] sm:$0xff] }
  0x3a   : > { %v430_v50 = vld [vmem:[#allocation2 + $0x70] sm:$0xff]  ;;  %v428_v52 = vld [vmem:[#allocation2 + $0x60] sm:$0xff]  ;;  %v431_v56 = vld [vmem:[#allocation2 + $0x78] sm:$0xff] }
  0x3b   : > { %1375 = vmatpush3.bf16.msra.mxu0 %v1523_v10  ;;  %1453 = vmatpush3.bf16.msra.mxu1 %v1523_v10  ;;  %v421_v61 = vld [vmem:[#allocation2 + $0x28] sm:$0xff]  ;;  %v758_v9 = vld [vmem:[%s2118_s4] sm:$0xff] (!%p1315_p12) }
  0x3c   : > { %1376 = vmatprep.subr.bf16.mxu0 %v1524_v11  ;;  %1446 = vmatprep.subr.bf16.mxu1 %v1524_v11  ;;  %v429_v62 = vld [vmem:[#allocation2 + $0x68] sm:$0xff] }
  0x3d   : > { %v759_v10 = vld [vmem:[%s2118_s4 + $0x8] sm:$0xff] (!%p1315_p12) }
  0x3f   : > { %1377 = vmatpush3.bf16.msra.mxu0 %v1524_v11  ;;  %1454 = vmatpush3.bf16.msra.mxu1 %v1524_v11  ;;  %v760_v11 = vld [vmem:[%s2118_s4 + $0x10] sm:$0xff] (!%p1315_p12) }
  0x40   : > { %1378 = vmatprep.subr.bf16.mxu0 %v1525_v12  ;;  %1447 = vmatprep.subr.bf16.mxu1 %v1525_v12 }
  0x43   : > { %1379 = vmatpush3.bf16.msra.mxu0 %v1525_v12  ;;  %1455 = vmatpush3.bf16.msra.mxu1 %v1525_v12  ;;  %v1436_v12 = vpack.c.bf16 (!%p1315_p12), %v759_v10, %v758_v9  ;;  %v1901_v10 = vld [vmem:[%s2119_s5] ss:$0 sm:$0xff] (!%p1315_p12) }
  0x44   : > { %1380 = vmatprep.subr.bf16.mxu0 %v1526_v13  ;;  %1448 = vmatprep.subr.bf16.mxu1 %v1526_v13 }
  0x47   : > { %1381 = vmatpush3.bf16.msra.mxu0 %v1526_v13  ;;  %1456 = vmatpush3.bf16.msra.mxu1 %v1526_v13  ;;  %v761_v13 = vld [vmem:[%s2118_s4 + $0x18] sm:$0xff] (!%p1315_p12) }
  0x48   : > { %1382 = vmatprep.subr.bf16.mxu0 %v1527_v14  ;;  %1449 = vmatprep.subr.bf16.mxu1 %v1527_v14  ;;  %v1440_v17 = vpack.c.bf16 (!%p1315_p12), %v761_v13, %v760_v11 }
  0x4b   : > { %1383 = vmatpush3.bf16.msra.mxu0 %v1527_v14  ;;  %1457 = vmatpush3.bf16.msra.mxu1 %v1527_v14  ;;  %v1803_v14 = vld [vmem:[%s1724_s12] sm:$0xff] (!%p1315_p12) }
  0x4c   : > { %1384 = vmatprep.subr.bf16.mxu0 %v1528_v15  ;;  %1450 = vmatprep.subr.bf16.mxu1 %v1528_v15 }
  0x4f   : > { %1385 = vmatpush3.bf16.msra.mxu0 %v1528_v15  ;;  %1458 = vmatpush3.bf16.msra.mxu1 %v1528_v15  ;;  %v1806_v15 = vld [vmem:[%s1724_s12 + $0x40] sm:$0xff] (!%p1315_p12) }
  0x50   : > { %1386 = vmatprep.subr.bf16.mxu0 %v1529_v16  ;;  %1451 = vmatprep.subr.bf16.mxu1 %v1529_v16 }
  0x53   : > { %1387 = vmatpush3.bf16.msra.mxu0 %v1529_v16  ;;  %1459 = vmatpush3.bf16.msra.mxu1 %v1529_v16  ;;  %v1621_v16 = vmov (!%p1315_p12), 0  }
  0x54   : > { %1531 = vset.pattern.permute.xlu1 (!%p1315_p12), %v1621_v16  ;;  %1530 = vset.pattern.permute.xlu0 (!%p1315_p12), %v1621_v16 }
  0x55   : > { %1437 = vmatprep.subr.bf16.mxu0 (!%p1315_p12), %v1436_v12  ;;  %1460 = vmatprep.subr.bf16.mxu1 (!%p1315_p12), %v1436_v12 }
  0x56   : > { %1389 = vmatmul.mubr.bf16.vlgmr.msra.gmra.mrb[0].mxu0 %v409_v19  ;;  %1397 = vmatmul.mubr.bf16.vlgmr.msra.gmra.mrb[0].mxu1 %v413_v20  ;;  %v1814_v19 = vld [vmem:[%s1724_s12 + $0x8] sm:$0xff] (!%p1315_p12) }
  0x57   : > { %1392 = vmatprep.mubr.bf16.mxu0 %v410_v21  ;;  %1400 = vmatprep.mubr.bf16.mxu1 %v414_v22  ;;  %v1817_v20 = vld [vmem:[%s1724_s12 + $0x48] sm:$0xff] (!%p1315_p12)  ;;  %v646_v21 = vld [vmem:[%s1729_s15] sm:$0xff] (!%p1315_p12)  ;;  %v1821_v22 = vld [vmem:[%s1724_s12 + $0x10] sm:$0xff] (!%p1315_p12) }
  0x58   : > { %1439 = vmatpush3.bf16.msra.mxu0 (!%p1315_p12), %v1436_v12  ;;  %1462 = vmatpush3.bf16.msra.mxu1 (!%p1315_p12), %v1436_v12 }
  0x59   : > { %1441 = vmatprep.subr.bf16.mxu0 (!%p1315_p12), %v1440_v17  ;;  %1461 = vmatprep.subr.bf16.mxu1 (!%p1315_p12), %v1440_v17 }
  0x5a   : > { %674 = vperm.xlu1 (!%p1315_p12), %1531, %v648_v18   ;;  %664 = vperm.xlu0 (!%p1315_p12), %1530, %v646_v21  }
  0x5c   : > { %1443 = vmatpush3.bf16.msra.mxu0 (!%p1315_p12), %v1440_v17  ;;  %1463 = vmatpush3.bf16.msra.mxu1 (!%p1315_p12), %v1440_v17 }
  0x5e   : > { %1393 = vmatmul.mubr.bf16.gmra.mrb[4].mxu0 %v411_v23  ;;  %1401 = vmatmul.mubr.bf16.gmra.mrb[4].mxu1 %v415_v24  ;;  %v1824_v23 = vld [vmem:[%s1724_s12 + $0x50] sm:$0xff] (!%p1315_p12)  ;;  %v649_v24 = vld [vmem:[%s1729_s15 + $0x18] sm:$0xff] (!%p1315_p12) }
  0x5f   : > { %1412 = vmatprep.mubr.msk.f32.mxu0 (!%p1315_p12), %vm593_vm1, %v1803_v14  ;;  %1424 = vmatprep.mubr.msk.f32.mxu1 (!%p1315_p12), %vm593_vm1, %v1806_v15 }
  0x60   : > { %679 = vperm.xlu1 (!%p1315_p12), %1531, %v649_v24  }
 0x129   : > { %v1390_v29 = vpop.f32.mrb[0].mxu0  ;;  %v1398_v30 = vpop.f32.mrb[0].mxu1 }
 0x12a   : > { %v579_v33 = vadd.f32 %v1390_v29, %v418_v25  ;;  %v587_v34 = vadd.f32 %v1398_v30, %v426_v26  ;;  %v514_v35 = vpop.f32.mrb[1].mxu0  ;;  %v546_v36 = vpop.f32.mrb[1].mxu1  ;;  %v647_v25 = vld [vmem:[%s1729_s15 + $0x8] sm:$0xff] (!%p1315_p12)  ;;  %1413 = vmatmul.mubr.msk.f32.vlgmr.msra.gmra.mrb[0].mxu0 (!%p1315_p12), %vm593_vm1, %v1814_v19  ;;  %1425 = vmatmul.mubr.msk.f32.vlgmr.msra.gmra.mrb[0].mxu1 (!%p1315_p12), %vm593_vm1, %v1817_v20  ;;  %v1837_v26 = vld [vmem:[%s1724_s12 + $0x18] sm:$0xff] (!%p1315_p12)  ;;  %v1846_v29 = vld [vmem:[%s1724_s12 + $0x60] sm:$0xff] (!%p1315_p12) }
 0x12b   : > { %v577_v39 = vadd.f32 %v514_v35, %v416_v27  ;;  %v585_v40 = vadd.f32 %v546_v36, %v424_v28  ;;  %v1391_v41 = vpop.f32.mrb[2].mxu0  ;;  %v1399_v42 = vpop.f32.mrb[2].mxu1  ;;  %1415 = vmatprep.mubr.msk.f32.mxu0 (!%p1315_p12), %vm593_vm1, %v1821_v22  ;;  %1427 = vmatprep.mubr.msk.f32.mxu1 (!%p1315_p12), %vm593_vm1, %v1824_v23  ;;  %v1840_v27 = vld [vmem:[%s1724_s12 + $0x58] sm:$0xff] (!%p1315_p12)  ;;  %v1843_v28 = vld [vmem:[%s1724_s12 + $0x20] sm:$0xff] (!%p1315_p12)  ;;  %v651_v30 = vld [vmem:[%s1729_s15 + $0x28] sm:$0xff] (!%p1315_p12) }
 0x12c   : > { %596 = vst.msk [vmem:[#allocation2 + $0x10] sm:$0xff] %vm593_vm1, %v579_v33  ;;  %604 = vst.msk [vmem:[#allocation2 + $0x50] sm:$0xff] %vm593_vm1, %v587_v34  ;;  %v580_v43 = vadd.f32 %v1391_v41, %v419_v31  ;;  %v588_v44 = vadd.f32 %v1399_v42, %v427_v32  ;;  %v517_v45 = vpop.f32.mrb[3].mxu0  ;;  %v549_v46 = vpop.f32.mrb[3].mxu1  ;;  %669 = vperm.xlu0 (!%p1315_p12), %1530, %v647_v25   ;;  %v650_v31 = vld [vmem:[%s1729_s15 + $0x20] sm:$0xff] (!%p1315_p12)  ;;  %v1859_v32 = vld [vmem:[%s1724_s12 + $0x28] sm:$0xff] (!%p1315_p12)  ;;  %689 = vperm.xlu1 (!%p1315_p12), %1531, %v651_v30  }
 0x12d   : > { %594 = vst.msk [vmem:[#allocation2] sm:$0xff] %vm593_vm1, %v577_v39  ;;  %602 = vst.msk [vmem:[#allocation2 + $0x40] sm:$0xff] %vm593_vm1, %v585_v40  ;;  %v578_v47 = vadd.f32 %v517_v45, %v417_v37  ;;  %v586_v48 = vadd.f32 %v549_v46, %v425_v38  ;;  %v1862_v33 = vld [vmem:[%s1724_s12 + $0x68] sm:$0xff] (!%p1315_p12)  ;;  %v1865_v34 = vld [vmem:[%s1724_s12 + $0x30] sm:$0xff] (!%p1315_p12) }
 0x12e   : > { %597 = vst.msk [vmem:[#allocation2 + $0x18] sm:$0xff] %vm593_vm1, %v580_v43  ;;  %605 = vst.msk [vmem:[#allocation2 + $0x58] sm:$0xff] %vm593_vm1, %v588_v44  ;;  %1416 = vmatmul.mubr.msk.f32.gmra.mrb[2].mxu0 (!%p1315_p12), %vm593_vm1, %v1837_v26  ;;  %1428 = vmatmul.mubr.msk.f32.gmra.mrb[2].mxu1 (!%p1315_p12), %vm593_vm1, %v1840_v27  ;;  %v1868_v35 = vld [vmem:[%s1724_s12 + $0x70] sm:$0xff] (!%p1315_p12)  ;;  %v653_v36 = vld [vmem:[%s1729_s15 + $0x38] sm:$0xff] (!%p1315_p12) }
 0x12f   : > { %595 = vst.msk [vmem:[#allocation2 + $0x8] sm:$0xff] %vm593_vm1, %v578_v47  ;;  %603 = vst.msk [vmem:[#allocation2 + $0x48] sm:$0xff] %vm593_vm1, %v586_v48  ;;  %1418 = vmatprep.mubr.msk.f32.mxu0 (!%p1315_p12), %vm593_vm1, %v1843_v28  ;;  %1430 = vmatprep.mubr.msk.f32.mxu1 (!%p1315_p12), %vm593_vm1, %v1846_v29  ;;  %v652_v37 = vld [vmem:[%s1729_s15 + $0x30] sm:$0xff] (!%p1315_p12)  ;;  %v1881_v38 = vld [vmem:[%s1724_s12 + $0x38] sm:$0xff] (!%p1315_p12)  ;;  %v675_v48 = vpop.permute.xlu1 (!%p1315_p12), %674 }
 0x130   : > { %684 = vperm.xlu0 (!%p1315_p12), %1530, %v650_v31   ;;  %v1884_v39 = vld [vmem:[%s1724_s12 + $0x78] sm:$0xff] (!%p1315_p12)  ;;  %699 = vperm.xlu1 (!%p1315_p12), %1531, %v653_v36   ;;  %v655_v40 = vld [vmem:[%s1729_s15 + $0x48] sm:$0xff] (!%p1315_p12)  ;;  %v654_v41 = vld [vmem:[%s1729_s15 + $0x40] sm:$0xff] (!%p1315_p12) }
 0x131   : > { %v1394_v53 = vpop.f32.mrb[4].mxu0  ;;  %v1402_v54 = vpop.f32.mrb[4].mxu1  ;;  %613 = sbr.rel (%p1315_p12) target bundleno = 717 (0x2cd), region = 90  ;;  %v657_v42 = vld [vmem:[%s1729_s15 + $0x58] sm:$0xff] (!%p1315_p12)  ;;  %v656_v43 = vld [vmem:[%s1729_s15 + $0x50] sm:$0xff] (!%p1315_p12)  ;;  %v659_v44 = vld [vmem:[%s1729_s15 + $0x68] sm:$0xff] (!%p1315_p12) }
 0x132   : > { %v583_v57 = vadd.f32 %v1394_v53, %v422_v49  ;;  %v591_v58 = vadd.f32 %v1402_v54, %v430_v50  ;;  %v530_v59 = vpop.f32.mrb[5].mxu0  ;;  %v562_v60 = vpop.f32.mrb[5].mxu1  ;;  %1419 = vmatmul.mubr.msk.f32.gmra.mrb[4].mxu0 (!%p1315_p12), %vm593_vm1, %v1859_v32  ;;  %1431 = vmatmul.mubr.msk.f32.gmra.mrb[4].mxu1 (!%p1315_p12), %vm593_vm1, %v1862_v33  ;;  %v658_v45 = vld [vmem:[%s1729_s15 + $0x60] sm:$0xff] (!%p1315_p12)  ;;  %v661_v46 = vld [vmem:[%s1729_s15 + $0x78] sm:$0xff] (!%p1315_p12)  ;;  %v660_v47 = vld [vmem:[%s1729_s15 + $0x70] sm:$0xff] (!%p1315_p12) }
 0x133   : > { %v581_v63 = vadd.f32 %v530_v59, %v420_v51  ;;  %v589_v0 = vadd.f32 %v562_v60, %v428_v52  ;;  %v1395_v1 = vpop.f32.mrb[6].mxu0  ;;  %v1403_v2 = vpop.f32.mrb[6].mxu1  ;;  %1421 = vmatprep.mubr.msk.f32.mxu0 (!%p1315_p12), %vm593_vm1, %v1865_v34  ;;  %1433 = vmatprep.mubr.msk.f32.mxu1 (!%p1315_p12), %vm593_vm1, %v1868_v35  ;;  %v640_v13 = vld [vmem:[#allocation2 + $0x50] sm:$0xff] (!%p1315_p12) }
 0x134   : > { %600 = vst.msk [vmem:[#allocation2 + $0x30] sm:$0xff] %vm593_vm1, %v583_v57  ;;  %608 = vst.msk [vmem:[#allocation2 + $0x70] sm:$0xff] %vm593_vm1, %v591_v58  ;;  %v584_v3 = vadd.f32 %v1395_v1, %v423_v55  ;;  %v592_v4 = vadd.f32 %v1403_v2, %v431_v56  ;;  %v533_v5 = vpop.f32.mrb[7].mxu0  ;;  %v565_v6 = vpop.f32.mrb[7].mxu1  ;;  %694 = vperm.xlu0 (!%p1315_p12), %1530, %v652_v37   ;;  %709 = vperm.xlu1 (!%p1315_p12), %1531, %v655_v40  }
 0x135   : > { %598 = vst.msk [vmem:[#allocation2 + $0x20] sm:$0xff] %vm593_vm1, %v581_v63  ;;  %606 = vst.msk [vmem:[#allocation2 + $0x60] sm:$0xff] %vm593_vm1, %v589_v0  ;;  %v582_v7 = vadd.f32 %v533_v5, %v421_v61  ;;  %v590_v8 = vadd.f32 %v565_v6, %v429_v62  ;;  %v665_v49 = vpop.permute.xlu0 (!%p1315_p12), %664  ;;  %v680_v50 = vpop.permute.xlu1 (!%p1315_p12), %679  ;;  %v630_v62 = vld [vmem:[#allocation2] sm:$0xff] (!%p1315_p12)  ;;  %v632_v0 = vld [vmem:[#allocation2 + $0x10] sm:$0xff] (!%p1315_p12) }
 0x136   : > { %601 = vst.msk [vmem:[#allocation2 + $0x38] sm:$0xff] %vm593_vm1, %v584_v3  ;;  %609 = vst.msk [vmem:[#allocation2 + $0x78] sm:$0xff] %vm593_vm1, %v592_v4  ;;  %1422 = vmatmul.mubr.msk.f32.gmra.mrb[6].mxu0 (!%p1315_p12), %vm593_vm1, %v1881_v38  ;;  %1434 = vmatmul.mubr.msk.f32.gmra.mrb[6].mxu1 (!%p1315_p12), %vm593_vm1, %v1884_v39  ;;  %v639_v60 = vld [vmem:[#allocation2 + $0x48] sm:$0xff] (!%p1315_p12)  ;;  %v638_v63 = vld [vmem:[#allocation2 + $0x40] sm:$0xff] (!%p1315_p12)  ;;  %v742_v6 = vmul.f32 (!%p1315_p12), %v665_v49, %v630_v62  ;;  %v744_v24 = vmul.f32 (!%p1315_p12), %v675_v48, %v632_v0 }
 0x137   : > { %599 = vst.msk [vmem:[#allocation2 + $0x28] sm:$0xff] %vm593_vm1, %v582_v7  ;;  %607 = vst.msk [vmem:[#allocation2 + $0x68] sm:$0xff] %vm593_vm1, %v590_v8  ;;  %v631_v61 = vld [vmem:[#allocation2 + $0x8] sm:$0xff] (!%p1315_p12)  ;;  %v633_v5 = vld [vmem:[#allocation2 + $0x18] sm:$0xff] (!%p1315_p12) }
 0x138   : > { %704 = vperm.xlu0 %1530, %v654_v41   ;;  %719 = vperm.xlu1 %1531, %v657_v42   ;;  %v641_v7 = vld [vmem:[#allocation2 + $0x58] sm:$0xff]  ;;  %v745_v31 = vmul.f32 %v680_v50, %v633_v5 }
 0x13c   : > { %714 = vperm.xlu0 %1530, %v656_v43   ;;  %729 = vperm.xlu1 %1531, %v659_v44   ;;  %v634_v40 = vld [vmem:[#allocation2 + $0x20] sm:$0xff]  ;;  %v636_v44 = vld [vmem:[#allocation2 + $0x30] sm:$0xff] }
 0x13d   : > { %v637_v36 = vld [vmem:[#allocation2 + $0x38] sm:$0xff] }
 0x13e   : > { %v635_v12 = vld [vmem:[#allocation2 + $0x28] sm:$0xff] }
 0x140   : > { %724 = vperm.xlu0 %1530, %v658_v45   ;;  %739 = vperm.xlu1 %1531, %v661_v46   ;;  %v642_v46 = vld [vmem:[#allocation2 + $0x60] sm:$0xff] }
 0x144   : > { %734 = vperm.xlu0 %1530, %v660_v47  }
 0x1ab   : > { %v670_v51 = vpop.permute.xlu0 %669  ;;  %v690_v52 = vpop.permute.xlu1 %689 }
 0x1ac   : > { %v743_v2 = vmul.f32 %v670_v51, %v631_v61  ;;  %v747_v43 = vmul.f32 %v690_v52, %v635_v12  ;;  %v643_v52 = vld [vmem:[#allocation2 + $0x68] sm:$0xff] }
 0x1af   : > { %v685_v53 = vpop.permute.xlu0 %684  ;;  %v700_v54 = vpop.permute.xlu1 %699 }
 0x1b0   : > { %v749_v62 = vmul.f32 %v700_v54, %v637_v36 }
 0x1b3   : > { %v695_v55 = vpop.permute.xlu0 %694  ;;  %v710_v56 = vpop.permute.xlu1 %709 }
 0x1b4   : > { %v751_v1 = vmul.f32 %v710_v56, %v639_v60 }
 0x1b7   : > { %v705_v57 = vpop.permute.xlu0 %704  ;;  %v720_v58 = vpop.permute.xlu1 %719 }
 0x1b8   : > { %v750_v8 = vmul.f32 %v705_v57, %v638_v63  ;;  %v753_v37 = vmul.f32 %v720_v58, %v641_v7  ;;  %v746_v63 = vmul.f32 %v685_v53, %v634_v40  ;;  %v645_v7 = vld [vmem:[#allocation2 + $0x78] sm:$0xff] }
 0x1bb   : > { %v715_v59 = vpop.permute.xlu0 %714  ;;  %v730_v3 = vpop.permute.xlu1 %729 }
 0x1bc   : > { %v752_v45 = vmul.f32 %v715_v59, %v640_v13 }
 0x1bf   : > { %v725_v4 = vpop.permute.xlu0 %724 }
 0x1c0   : > { %v754_v5 = vmul.f32 %v725_v4, %v642_v46 }
 0x1fd   : > { %v1414_v9 = vpop.f32.mrb[0].mxu0  ;;  %v1426_v11 = vpop.f32.mrb[0].mxu1 }
 0x1fe   : > { %v956_v16 = vadd.f32 %v1414_v9, %v743_v2  ;;  %v964_v17 = vadd.f32 %v1426_v11, %v751_v1  ;;  %v876_v18 = vpop.f32.mrb[1].mxu0  ;;  %v916_v21 = vpop.f32.mrb[1].mxu1  ;;  %v748_v1 = vmul.f32 %v695_v55, %v636_v44 }
 0x1ff   : > { %v955_v25 = vadd.f32 %v876_v18, %v742_v6  ;;  %v963_v30 = vadd.f32 %v916_v21, %v750_v8  ;;  %v740_v2 = vpop.permute.xlu1 %739  ;;  %v735_v6 = vpop.permute.xlu0 %734  ;;  %v644_v8 = vld [vmem:[#allocation2 + $0x70] sm:$0xff] }
 0x200   : > { %v979_v41 = vadd.f32 %v1901_v10, %v956_v16  ;;  %v987_v42 = vadd.f32 %v1901_v10, %v964_v17  ;;  %v755_v16 = vmul.f32 %v730_v3, %v643_v52 }
 0x201   : > { %v1906_v47 = vadd.f32 %v1901_v10, %v955_v25  ;;  %v1909_v49 = vadd.f32 %v1901_v10, %v963_v30  ;;  %v1417_v48 = vpop.f32.mrb[2].mxu0  ;;  %v1429_v51 = vpop.f32.mrb[2].mxu1 }
 0x202   : > { %v1011_v50 = vmul.f32 0.01, %v979_v41  ;;  %v1019_v56 = vmul.f32 0.01, %v987_v42  ;;  %v958_v57 = vadd.f32 %v1417_v48, %v745_v31  ;;  %v966_v58 = vadd.f32 %v1429_v51, %v753_v37  ;;  %v886_v60 = vpop.f32.mrb[3].mxu0  ;;  %v926_v61 = vpop.f32.mrb[3].mxu1 }
 0x203   : > { %v957_v0 = vadd.f32 %v886_v60, %v744_v24  ;;  %v965_v59 = vadd.f32 %v926_v61, %v752_v45  ;;  %vm1003_vm2 = vcmp.ge.f32.partialorder %v987_v42, 0.0  ;;  %vm995_vm3 = vcmp.ge.f32.partialorder %v979_v41, 0.0 }
 0x204   : > { %v981_v9 = vadd.f32 %v1901_v10, %v958_v57  ;;  %v1913_v11 = vadd.f32 %v1901_v10, %v966_v58  ;;  %v1035_v54 = vsel %vm1003_vm2, %v987_v42, %v1019_v56  ;;  %v1027_v53 = vsel %vm995_vm3, %v979_v41, %v1011_v50 }
 0x205   : > { %v1420_v12 = vpop.f32.mrb[4].mxu0  ;;  %v1432_v13 = vpop.f32.mrb[4].mxu1  ;;  %v1010_v17 = vmul.f32 0.01, %v1906_v47  ;;  %v1018_v55 = vmul.f32 0.01, %v1909_v49  ;;  %v1918_v24 = vadd.f32 %v1901_v10, %v957_v0  ;;  %v988_v25 = vadd.f32 %v1901_v10, %v965_v59 }
 0x206   : > { %v960_v4 = vadd.f32 %v1420_v12, %v747_v43  ;;  %v896_v18 = vpop.f32.mrb[5].mxu0  ;;  %v936_v21 = vpop.f32.mrb[5].mxu1  ;;  %v968_v37 = vadd.f32 %v1432_v13, %v755_v16  ;;  %v1925_v3 = vadd.f32 %v1035_v54, %v1817_v20  ;;  %v1928_v40 = vadd.f32 %v1027_v53, %v1814_v19 }
 0x207   : > { %v959_v30 = vadd.f32 %v896_v18, %v746_v63  ;;  %v967_v31 = vadd.f32 %v936_v21, %v754_v5  ;;  %v757_v41 = vmul.f32 %v740_v2, %v645_v7  ;;  %v756_v42 = vmul.f32 %v735_v6, %v644_v8 }
 0x208   : > { %v1922_v36 = vadd.f32 %v1901_v10, %v960_v4  ;;  %v1013_v43 = vmul.f32 0.01, %v981_v9  ;;  %v1021_v44 = vmul.f32 0.01, %v1913_v11  ;;  %vm1002_vm4 = vcmp.ge.f32.partialorder %v1909_v49, 0.0 }
 0x209   : > { %v1423_v45 = vpop.f32.mrb[6].mxu0  ;;  %v1435_v46 = vpop.f32.mrb[6].mxu1  ;;  %v982_v48 = vadd.f32 %v1901_v10, %v959_v30  ;;  %v990_v51 = vadd.f32 %v1901_v10, %v967_v31  ;;  %vm994_vm5 = vcmp.ge.f32.partialorder %v1906_v47, 0.0  ;;  %v1012_v19 = vmul.f32 0.01, %v1918_v24 }
 0x20a   : > { %v946_v50 = vpop.f32.mrb[7].mxu1  ;;  %v906_v56 = vpop.f32.mrb[7].mxu0  ;;  %v1020_v20 = vmul.f32 0.01, %v988_v25  ;;  %v1067_v57 = vmul.f32 %v1925_v3, %v1925_v3  ;;  %v1015_v60 = vmul.f32 0.01, %v1922_v36  ;;  %v1940_v61 = vadd.f32 %v1901_v10, %v968_v37 }
 0x20b   : > { %v969_v58 = vadd.f32 %v946_v50, %v756_v42  ;;  %v1059_v63 = vmul.f32 %v1928_v40, %v1928_v40  ;;  %v961_v52 = vadd.f32 %v906_v56, %v748_v1  ;;  %v962_v0 = vadd.f32 %v1423_v45, %v749_v62 }
 0x20c   : > { %v1101_v59 = vsel %vm593_vm1, %v1067_v57, 0.0  ;;  %v1034_v2 = vsel %vm1002_vm4, %v1909_v49, %v1018_v55  ;;  %v1026_v5 = vsel %vm994_vm5, %v1906_v47, %v1010_v17  ;;  %v1014_v6 = vmul.f32 0.01, %v982_v48 }
 0x20d   : > { %v1022_v7 = vmul.f32 0.01, %v990_v51  ;;  %1102 = vadd.xlane.f32.xlu0 %v1101_v59  ;;  %v1077_v8 = vsel %vm593_vm1, %v1059_v63, 0.0  ;;  %v984_v12 = vadd.f32 %v1901_v10, %v961_v52  ;;  %v992_v13 = vadd.f32 %v1901_v10, %v969_v58 }
 0x20e   : > { %1078 = vadd.xlane.f32.xlu1 %v1077_v8  ;;  %v1951_v54 = vadd.f32 %v1034_v2, %v1806_v15  ;;  %v1954_v62 = vadd.f32 %v1026_v5, %v1803_v14  ;;  %vm1004_vm6 = vcmp.ge.f32.partialorder %v988_v25, 0.0  ;;  %vm997_vm7 = vcmp.ge.f32.partialorder %v981_v9, 0.0 }
 0x20f   : > { %v1016_v49 = vmul.f32 0.01, %v984_v12  ;;  %v1036_v1 = vsel %vm1004_vm6, %v988_v25, %v1020_v20  ;;  %vm1005_vm8 = vcmp.ge.f32.partialorder %v1913_v11, 0.0  ;;  %v1029_v15 = vsel %vm997_vm7, %v981_v9, %v1013_v43 }
 0x210   : > { %v1066_v47 = vmul.f32 %v1951_v54, %v1951_v54  ;;  %v1058_v53 = vmul.f32 %v1954_v62, %v1954_v62  ;;  %v1962_v16 = vadd.f32 %v1036_v1, %v1824_v23  ;;  %v1965_v17 = vadd.f32 %v1029_v15, %v1837_v26 }
 0x211   : > { %v1037_v14 = vsel %vm1005_vm8, %v1913_v11, %v1021_v44  ;;  %vm998_vm9 = vcmp.ge.f32.partialorder %v982_v48, 0.0  ;;  %vm996_vm10 = vcmp.ge.f32.partialorder %v1918_v24, 0.0  ;;  %vm1006_vm11 = vcmp.ge.f32.partialorder %v990_v51, 0.0 }
 0x212   : > { %v1098_v55 = vsel %vm593_vm1, %v1066_v47, 0.0  ;;  %v1074_v4 = vsel %vm593_vm1, %v1058_v53, 0.0  ;;  %v1068_v18 = vmul.f32 %v1962_v16, %v1962_v16  ;;  %v1974_v21 = vadd.f32 %v1037_v14, %v1840_v27 }
 0x213   : > { %1099 = vadd.xlane.f32.xlu1 %v1098_v55  ;;  %1075 = vadd.xlane.f32.xlu0 %v1074_v4  ;;  %v1061_v23 = vmul.f32 %v1965_v17, %v1965_v17  ;;  %v1030_v26 = vsel %vm998_vm9, %v982_v48, %v1014_v6  ;;  %v1028_v9 = vsel %vm996_vm10, %v1918_v24, %v1012_v19  ;;  %v1023_v11 = vmul.f32 0.01, %v1940_v61 }
 0x214   : > { %v970_v25 = vadd.f32 %v1435_v46, %v757_v41  ;;  %v1104_v30 = vsel %vm593_vm1, %v1068_v18, 0.0  ;;  %v1982_v31 = vadd.f32 %v1030_v26, %v1843_v28  ;;  %v1985_v27 = vadd.f32 %v1028_v9, %v1821_v22 }
 0x215   : > { %v1038_v37 = vsel %vm1006_vm11, %v990_v51, %v1022_v7  ;;  %vm999_vm12 = vcmp.ge.f32.partialorder %v1922_v36, 0.0  ;;  %vm1000_vm13 = vcmp.ge.f32.partialorder %v984_v12, 0.0  ;;  %v1083_v42 = vsel %vm593_vm1, %v1061_v23, 0.0 }
 0x216   : > { %v1069_v24 = vmul.f32 %v1974_v21, %v1974_v21  ;;  %v1062_v41 = vmul.f32 %v1982_v31, %v1982_v31  ;;  %v1994_v43 = vadd.f32 %v1038_v37, %v1846_v29  ;;  %v985_v28 = vadd.f32 %v1901_v10, %v962_v0 }
 0x217   : > { %v1024_v44 = vmul.f32 0.01, %v992_v13  ;;  %1105 = vadd.xlane.f32.xlu1 %v1104_v30  ;;  %1084 = vadd.xlane.f32.xlu0 %v1083_v42  ;;  %v1031_v22 = vsel %vm999_vm12, %v1922_v36, %v1015_v60  ;;  %v1032_v45 = vsel %vm1000_vm13, %v984_v12, %v1016_v49  ;;  %vm1007_vm14 = vcmp.ge.f32.partialorder %v1940_v61, 0.0 }
 0x218   : > { %vm1008_vm15 = vcmp.ge.f32.partialorder %v992_v13, 0.0  ;;  %v1060_v46 = vmul.f32 %v1985_v27, %v1985_v27  ;;  %v2002_v48 = vadd.f32 %v1031_v22, %v1859_v32  ;;  %v1107_v29 = vsel %vm593_vm1, %v1069_v24, 0.0 }
 0x219   : > { %v1086_v51 = vsel %vm593_vm1, %v1062_v41, 0.0  ;;  %v1070_v50 = vmul.f32 %v1994_v43, %v1994_v43  ;;  %v2009_v56 = vadd.f32 %v1032_v45, %v1865_v34  ;;  %v1017_v36 = vmul.f32 0.01, %v985_v28 }
 0x21a   : > { %v993_v19 = vadd.f32 %v1901_v10, %v970_v25  ;;  %v1039_v20 = vsel %vm1007_vm14, %v1940_v61, %v1023_v11  ;;  %v1040_v57 = vsel %vm1008_vm15, %v992_v13, %v1024_v44  ;;  %vm1001_vm0 = vcmp.ge.f32.partialorder %v985_v28, 0.0 }
 0x21b   : > { %1108 = vadd.xlane.f32.xlu0 %v1107_v29  ;;  %1087 = vadd.xlane.f32.xlu1 %v1086_v51  ;;  %v1080_v32 = vsel %vm593_vm1, %v1060_v46, 0.0  ;;  %v1063_v58 = vmul.f32 %v2002_v48, %v2002_v48  ;;  %v1110_v60 = vsel %vm593_vm1, %v1070_v50, 0.0  ;;  %v1064_v34 = vmul.f32 %v2009_v56, %v2009_v56 }
 0x21c   : > { %v2020_v63 = vadd.f32 %v1039_v20, %v1862_v33  ;;  %v2023_v10 = vadd.f32 %v1040_v57, %v1868_v35  ;;  %v1025_v52 = vmul.f32 0.01, %v993_v19  ;;  %v1033_v61 = vsel %vm1001_vm0, %v985_v28, %v1017_v36 }
 0x21d   : > { %vm1009_vm2 = vcmp.ge.f32.partialorder %v993_v19, 0.0  ;;  %v1089_v0 = vsel %vm593_vm1, %v1063_v58, 0.0  ;;  %v1092_v59 = vsel %vm593_vm1, %v1064_v34, 0.0  ;;  %v2032_v33 = vadd.f32 %v1033_v61, %v1881_v38 }
 0x21e   : > { %v1071_v2 = vmul.f32 %v2020_v63, %v2020_v63  ;;  %v1072_v5 = vmul.f32 %v2023_v10, %v2023_v10  ;;  %v1041_v35 = vsel %vm1009_vm2, %v993_v19, %v1025_v52 }
 0x21f   : > { %1081 = vadd.xlane.f32.xlu0 %v1080_v32  ;;  %1111 = vadd.xlane.f32.xlu1 %v1110_v60  ;;  %v1065_v8 = vmul.f32 %v2032_v33, %v2032_v33  ;;  %v2039_v12 = vadd.f32 %v1041_v35, %v1884_v39 }
 0x220   : > { %v1113_v6 = vsel %vm593_vm1, %v1071_v2, 0.0  ;;  %v1116_v7 = vsel %vm593_vm1, %v1072_v5, 0.0 }
 0x221   : > { %v1095_v13 = vsel %vm593_vm1, %v1065_v8, 0.0  ;;  %v1073_v38 = vmul.f32 %v2039_v12, %v2039_v12 }
 0x223   : > { %1090 = vadd.xlane.f32.xlu0 %v1089_v0  ;;  %1093 = vadd.xlane.f32.xlu1 %v1092_v59  ;;  %v1119_v49 = vsel %vm593_vm1, %v1073_v38, 0.0 }
 0x227   : > { %1114 = vadd.xlane.f32.xlu0 %v1113_v6  ;;  %1117 = vadd.xlane.f32.xlu1 %v1116_v7 }
 0x22b   : > { %1096 = vadd.xlane.f32.xlu0 %v1095_v13 }
 0x22f   : > { %1120 = vadd.xlane.f32.xlu0 %v1119_v49 }
 0x29a   : > { %v1103_v1 = vpop.xlane.xlu0 %1102 }
 0x29b   : > { %v1131_v47 = vmax.f32 %v1103_v1, 1e-24  ;;  %v1079_v53 = vpop.xlane.xlu1 %1078 }
 0x29c   : > { %v1123_v15 = vmax.f32 %v1079_v53, 1e-24 }
 0x29d   : > { %1532 = vrsqrt.f32 %v1131_v47 }
 0x29e   : > { %1534 = vrsqrt.f32 %v1123_v15 }
 0x2a0   : > { %v1100_v14 = vpop.xlane.xlu1 %1099  ;;  %v1076_v39 = vpop.xlane.xlu0 %1075 }
 0x2a1   : > { %v1130_v55 = vmax.f32 %v1100_v14, 1e-24  ;;  %v1122_v4 = vmax.f32 %v1076_v39, 1e-24 }
 0x2a3   : > { %1536 = vrsqrt.f32 %v1130_v55 }
 0x2a4   : > { %1538 = vrsqrt.f32 %v1122_v4  ;;  %v1106_v18 = vpop.xlane.xlu1 %1105  ;;  %v1085_v23 = vpop.xlane.xlu0 %1084 }
 0x2a5   : > { %v1132_v26 = vmax.f32 %v1106_v18, 1e-24  ;;  %v1125_v9 = vmax.f32 %v1085_v23, 1e-24 }
 0x2a7   : > { %v1533_v11 = vpop.eup %1532  ;;  %1540 = vrsqrt.f32 %v1132_v26 }
 0x2a8   : > { %v1535_v25 = vpop.eup %1534  ;;  %v1163_v30 = vmul.f32 %v1533_v11, %v1925_v3  ;;  %1542 = vrsqrt.f32 %v1125_v9  ;;  %v1109_v37 = vpop.xlane.xlu0 %1108 }
 0x2a9   : > { %v1088_v42 = vpop.xlane.xlu1 %1087  ;;  %v1155_v24 = vmul.f32 %v1535_v25, %v1928_v40  ;;  %v1133_v41 = vmax.f32 %v1109_v37, 1e-24 }
 0x2aa   : > { %v1126_v28 = vmax.f32 %v1088_v42, 1e-24  ;;  %1179 = vst.msk [vmem:[%s1734_s18 + $0x48] sm:$0xff] %vm593_vm1, %v1163_v30 }
 0x2ab   : > { %1171 = vst.msk [vmem:[%s1734_s18 + $0x8] sm:$0xff] %vm593_vm1, %v1155_v24  ;;  %1544 = vrsqrt.f32 %v1133_v41 }
 0x2ac   : > { %1546 = vrsqrt.f32 %v1126_v28  ;;  %v1082_v44 = vpop.xlane.xlu0 %1081 }
 0x2ad   : > { %v1112_v22 = vpop.xlane.xlu1 %1111  ;;  %v1537_v45 = vpop.eup %1536  ;;  %v1124_v46 = vmax.f32 %v1082_v44, 1e-24 }
 0x2ae   : > { %v1134_v3 = vmax.f32 %v1112_v22, 1e-24  ;;  %v1539_v29 = vpop.eup %1538  ;;  %v1162_v51 = vmul.f32 %v1537_v45, %v1951_v54 }
 0x2af   : > { %v1154_v40 = vmul.f32 %v1539_v29, %v1954_v62  ;;  %1548 = vrsqrt.f32 %v1124_v46 }
 0x2b0   : > { %1178 = vst.msk [vmem:[%s1734_s18 + $0x40] sm:$0xff] %vm593_vm1, %v1162_v51  ;;  %1550 = vrsqrt.f32 %v1134_v3  ;;  %v1091_v50 = vpop.xlane.xlu0 %1090 }
 0x2b1   : > { %v1094_v36 = vpop.xlane.xlu1 %1093  ;;  %v1541_v19 = vpop.eup %1540  ;;  %1170 = vst.msk [vmem:[%s1734_s18] sm:$0xff] %vm593_vm1, %v1154_v40  ;;  %v1127_v20 = vmax.f32 %v1091_v50, 1e-24 }
 0x2b2   : > { %v1128_v57 = vmax.f32 %v1094_v36, 1e-24  ;;  %v1543_v32 = vpop.eup %1542  ;;  %v1164_v58 = vmul.f32 %v1541_v19, %v1962_v16 }
 0x2b3   : > { %v1157_v54 = vmul.f32 %v1543_v32, %v1965_v17  ;;  %1552 = vrsqrt.f32 %v1127_v20 }
 0x2b4   : > { %1180 = vst.msk [vmem:[%s1734_s18 + $0x50] sm:$0xff] %vm593_vm1, %v1164_v58  ;;  %1554 = vrsqrt.f32 %v1128_v57  ;;  %v1115_v62 = vpop.xlane.xlu0 %1114 }
 0x2b5   : > { %v1118_v60 = vpop.xlane.xlu1 %1117  ;;  %v1545_v34 = vpop.eup %1544  ;;  %1173 = vst.msk [vmem:[%s1734_s18 + $0x18] sm:$0xff] %vm593_vm1, %v1157_v54  ;;  %v1135_v52 = vmax.f32 %v1115_v62, 1e-24 }
 0x2b6   : > { %v1136_v61 = vmax.f32 %v1118_v60, 1e-24  ;;  %v1547_v0 = vpop.eup %1546  ;;  %v1165_v59 = vmul.f32 %v1545_v34, %v1974_v21 }
 0x2b7   : > { %v1158_v16 = vmul.f32 %v1547_v0, %v1982_v31  ;;  %1556 = vrsqrt.f32 %v1135_v52 }
 0x2b8   : > { %1181 = vst.msk [vmem:[%s1734_s18 + $0x58] sm:$0xff] %vm593_vm1, %v1165_v59  ;;  %1558 = vrsqrt.f32 %v1136_v61  ;;  %v1097_v17 = vpop.xlane.xlu0 %1096 }
 0x2b9   : > { %v1549_v2 = vpop.eup %1548  ;;  %1174 = vst.msk [vmem:[%s1734_s18 + $0x20] sm:$0xff] %vm593_vm1, %v1158_v16  ;;  %v1129_v5 = vmax.f32 %v1097_v17, 1e-24 }
 0x2ba   : > { %v1551_v35 = vpop.eup %1550  ;;  %v1156_v6 = vmul.f32 %v1549_v2, %v1985_v27 }
 0x2bb   : > { %v1166_v7 = vmul.f32 %v1551_v35, %v1994_v43  ;;  %1560 = vrsqrt.f32 %v1129_v5 }
 0x2bc   : > { %1172 = vst.msk [vmem:[%s1734_s18 + $0x10] sm:$0xff] %vm593_vm1, %v1156_v6  ;;  %v1121_v21 = vpop.xlane.xlu0 %1120 }
 0x2bd   : > { %v1553_v31 = vpop.eup %1552  ;;  %1182 = vst.msk [vmem:[%s1734_s18 + $0x60] sm:$0xff] %vm593_vm1, %v1166_v7  ;;  %v1137_v8 = vmax.f32 %v1121_v21, 1e-24 }
 0x2be   : > { %v1555_v13 = vpop.eup %1554  ;;  %v1159_v38 = vmul.f32 %v1553_v31, %v2002_v48 }
 0x2bf   : > { %v1160_v49 = vmul.f32 %v1555_v13, %v2009_v56  ;;  %1562 = vrsqrt.f32 %v1137_v8 }
 0x2c0   : > { %1175 = vst.msk [vmem:[%s1734_s18 + $0x28] sm:$0xff] %vm593_vm1, %v1159_v38 }
 0x2c1   : > { %v1557_v27 = vpop.eup %1556  ;;  %1176 = vst.msk [vmem:[%s1734_s18 + $0x30] sm:$0xff] %vm593_vm1, %v1160_v49 }
 0x2c2   : > { %v1559_v43 = vpop.eup %1558  ;;  %v1167_v1 = vmul.f32 %v1557_v27, %v2020_v63 }
 0x2c3   : > { %v1168_v47 = vmul.f32 %v1559_v43, %v2023_v10 }
 0x2c4   : > { %1183 = vst.msk [vmem:[%s1734_s18 + $0x68] sm:$0xff] %vm593_vm1, %v1167_v1 }
 0x2c5   : > { %v1561_v53 = vpop.eup %1560  ;;  %1184 = vst.msk [vmem:[%s1734_s18 + $0x70] sm:$0xff] %vm593_vm1, %v1168_v47 }
 0x2c6   : > { %v1161_v48 = vmul.f32 %v1561_v53, %v2032_v33 }
 0x2c8   : > { %1177 = vst.msk [vmem:[%s1734_s18 + $0x38] sm:$0xff] %vm593_vm1, %v1161_v48 }
 0x2c9   : > { %v1563_v56 = vpop.eup %1562 }
 0x2ca   : > { %v1169_v15 = vmul.f32 %v1563_v56, %v2039_v12 }
 0x2cc   : > { %1185 = vst.msk [vmem:[%s1734_s18 + $0x78] sm:$0xff] %vm593_vm1, %v1169_v15 }
 0x2cd PF: > { %s16_s27 = sadd.s32 1, %s1618_s27   ;;  %s2121_s21 = smov %s1598_s22 }
 0x2ce   : > { %p13_p13 = scmp.ge.s32.totalorder %s16_s27, 18   ;;  %s2122_s22 = smov %s1708_s10 }
 0x2cf   : > { %s2123_s23 = smov %s1610_s25  ;;  %s2124_s24 = smov %s1614_s26 }
 0x2d0   : > { %s2125_s25 = smov %s2128_s28  ;;  %s2126_s26 = smov %s2132_s29 }
 0x2d1   :  { %15 = sbr.rel (!%p13_p13) target bundleno = 4 (0x4), region = 132 }

</bundles_post_ra>
